<compile_context>
chip_gen: v7x
topology: tpu7x:2x2x1
jax: 0.10.0
libtpu: 0.0.40
codegen_flags: <defaults>
</compile_context>

<pallas_src>
import math
import functools

import jax
import jax.numpy as jnp
from jax.experimental import pallas as pl
from jax.experimental.pallas import tpu as pltpu


def _round_up(x: int, m: int) -> int:
    return ((x + m - 1) // m) * m


def _cdiv(a: int, b: int) -> int:
    return (a + b - 1) // b


def _sinusoidal_kernel(time_ref, freqs_ref, out_ref, *, half_dim: int):
    # time_ref : (tb, 1)    float32 VMEM  (one column of timesteps)
    # freqs_ref: (1, dim)   float32 VMEM  (constant: [freqs, freqs], resident)
    # out_ref  : (tb, dim)  float32 VMEM
    t = time_ref[...]                       # (tb, 1)
    freqs2 = freqs_ref[...]                 # (1, dim)
    args = t * freqs2                       # (tb, dim) via broadcast
    lane = jax.lax.broadcasted_iota(jnp.int32, args.shape, dimension=1)
    # First half_dim lanes get sin, remaining lanes cos -> single full-width,
    # lane-dense store (matches torch.cat((sin, cos), dim=-1) exactly).
    out_ref[...] = jnp.where(lane < half_dim, jnp.sin(args), jnp.cos(args))


def sinusoidal_position_embeddings(time: jax.Array, dim: int,
                                   block_b: int = 512) -> jax.Array:
    """JAX/Pallas equivalent of SinusoidalPositionEmbeddings(dim)(time)."""
    assert dim % 2 == 0, "dim must be even"
    assert dim >= 4, "dim must be >= 4 (half_dim - 1 would be zero otherwise)"
    half_dim = dim // 2
    B = time.shape[0]

    # Constant frequency table, computed once at trace time; duplicated so a
    # single (1, dim) row covers both the sin and cos halves.
    scale = math.log(10000.0) / (half_dim - 1)
    freqs = jnp.exp(jnp.arange(half_dim, dtype=jnp.float32) * (-scale))
    freqs2 = jnp.concatenate([freqs, freqs]).reshape(1, dim)

    # ---- batch tile selection -------------------------------------------
    # v5e scoped-VMEM guard: double-buffered f32 output block must stay well
    # under the 16 MiB default scoped VMEM (2 * tb * dim * 4B <= ~12 MiB).
    vmem_row_cap = max(8, ((12 * 1024 * 1024) // (2 * 4 * dim)) // 8 * 8)
    eff_block_b = min(block_b, vmem_row_cap)

    # Balanced tiling: >= 2 grid steps (so output writeback double-buffers and
    # v7x's 2 TCs both get work), even step count when > 2, and padding waste
    # bounded by one balanced tile.
    n_tiles = max(2, _cdiv(B, eff_block_b))
    if n_tiles > 2 and n_tiles % 2 == 1:
        n_tiles += 1                       # even grid for the 2-TC split on v7x
    tb = min(eff_block_b, _round_up(_cdiv(B, n_tiles), 8))
    b_pad = _round_up(B, tb)
    grid = (b_pad // tb,)

    t2d = time.astype(jnp.float32).reshape(B, 1)
    if b_pad != B:
        t2d = jnp.pad(t2d, ((0, b_pad - B), (0, 0)))

    out = pl.pallas_call(
        functools.partial(_sinusoidal_kernel, half_dim=half_dim),
        out_shape=jax.ShapeDtypeStruct((b_pad, dim), jnp.float32),
        grid=grid,
        in_specs=[
            pl.BlockSpec((tb, 1), lambda i: (i, 0)),        # time column
            pl.BlockSpec((1, dim), lambda i: (0, 0)),       # resident freqs2
        ],
        out_specs=pl.BlockSpec((tb, dim), lambda i: (i, 0)),
        compiler_params=pltpu.CompilerParams(
            dimension_semantics=("parallel",),
        ),
    )(t2d, freqs2)

    return out[:B] if b_pad != B else out


def _reference(time: jax.Array, dim: int) -> jax.Array:
    """Pure-JAX reference mirroring the PyTorch forward."""
    half_dim = dim // 2
    emb = math.log(10000.0) / (half_dim - 1)
    emb = jnp.exp(jnp.arange(half_dim, dtype=jnp.float32) * -emb)
    emb = time.astype(jnp.float32)[:, None] * emb[None, :]
    return jnp.concatenate([jnp.sin(emb), jnp.cos(emb)], axis=-1)


if __name__ == "__main__":
    key = jax.random.PRNGKey(0)
    B, DIM = 8, 32
    # Timesteps like a diffusion schedule: random floats in [0, 1000).
    time = jax.random.uniform(key, (B,), dtype=jnp.float32,
                              minval=0.0, maxval=1000.0)

    out = sinusoidal_position_embeddings(time, DIM)
    out = jax.block_until_ready(out)

    ref = _reference(time, DIM)
    assert out.shape == (B, DIM), out.shape
    assert jnp.allclose(out, ref, atol=1e-5, rtol=1e-5), "mismatch vs reference"

    # Non-tile-aligned batch: exercises padding + grid > 1 (balanced tiles).
    B2 = 13
    time2 = jax.random.uniform(jax.random.PRNGKey(1), (B2,), dtype=jnp.float32,
                               minval=0.0, maxval=1000.0)
    out2 = jax.block_until_ready(sinusoidal_position_embeddings(time2, DIM))
    ref2 = _reference(time2, DIM)
    assert out2.shape == (B2, DIM), out2.shape
    assert jnp.allclose(out2, ref2, atol=1e-5, rtol=1e-5), "mismatch (padded case)"

    # Larger batch: multi-step grid with double-buffered writeback.
    B3 = 600
    time3 = jax.random.uniform(jax.random.PRNGKey(2), (B3,), dtype=jnp.float32,
                               minval=0.0, maxval=1000.0)
    out3 = jax.block_until_ready(sinusoidal_position_embeddings(time3, DIM))
    ref3 = _reference(time3, DIM)
    assert out3.shape == (B3, DIM), out3.shape
    assert jnp.allclose(out3, ref3, atol=1e-5, rtol=1e-5), "mismatch (large batch)"

    print("KERNEL_OK")
</pallas_src>

<mosaic_0001>
module attributes {stable_mosaic.version = 11 : i64} {
  func.func @_sinusoidal_kernel(%arg0: i32, %arg1: memref<8x1xf32, #tpu.memory_space<vmem>>, %arg2: memref<1x32xf32, #tpu.memory_space<vmem>>, %arg3: memref<8x32xf32, #tpu.memory_space<vmem>>) attributes {dimension_semantics = [#tpu.dimension_semantics<parallel>], iteration_bounds = array<i64: 1>, scalar_prefetch = 0 : i64, scratch_operands = 0 : i64, tpu.core_type = #tpu.core_type<tc>, window_params = [{transform_indices = @transform_0, window_bounds = array<i64: 8, 1>}, {pipeline_mode = #tpu.pipeline_mode<synchronous>, transform_indices = @transform_1, window_bounds = array<i64: 1, 32>}, {transform_indices = @transform_2, window_bounds = array<i64: 8, 32>}]} {
    %c0 = arith.constant 0 : index
    %c0_0 = arith.constant 0 : index
    %0 = vector.load %arg1[%c0, %c0_0] : memref<8x1xf32, #tpu.memory_space<vmem>>, vector<8x1xf32>
    %c0_1 = arith.constant 0 : index
    %c0_2 = arith.constant 0 : index
    %1 = vector.load %arg2[%c0_1, %c0_2] : memref<1x32xf32, #tpu.memory_space<vmem>>, vector<1x32xf32>
    %2 = vector.broadcast %0 : vector<8x1xf32> to vector<8x32xf32>
    %3 = vector.broadcast %1 : vector<1x32xf32> to vector<8x32xf32>
    %4 = arith.mulf %2, %3 : vector<8x32xf32>
    %5 = tpu.iota {dimensions = array<i32: 1>} : vector<8x32xi32>
    %c16_i32 = arith.constant 16 : i32
    %6 = vector.broadcast %c16_i32 : i32 to vector<8x32xi32>
    %7 = arith.cmpi slt, %5, %6 : vector<8x32xi32>
    %8 = math.sin %4 : vector<8x32xf32>
    %9 = math.cos %4 : vector<8x32xf32>
    %10 = arith.select %7, %8, %9 : vector<8x32xi1>, vector<8x32xf32>
    %c0_3 = arith.constant 0 : index
    %c0_4 = arith.constant 0 : index
    %11 = vector.load %arg3[%c0_3, %c0_4] : memref<8x32xf32, #tpu.memory_space<vmem>>, vector<8x32xf32>
    tpu.vector_store %arg3[%c0_3, %c0_4], %10 {strides = array<i32>} : memref<8x32xf32, #tpu.memory_space<vmem>>, vector<8x32xf32>,
    return
  }
  func.func @transform_0(%arg0: i32) -> (i32, i32) {
    %c0_i32 = arith.constant 0 : i32
    %c0_i32_0 = arith.constant 0 : i32
    return %arg0, %c0_i32 : i32, i32
  }
  func.func @transform_1(%arg0: i32) -> (i32, i32) {
    %c0_i32 = arith.constant 0 : i32
    %c0_i32_0 = arith.constant 0 : i32
    %c0_i32_1 = arith.constant 0 : i32
    return %c0_i32, %c0_i32_0 : i32, i32
  }
  func.func @transform_2(%arg0: i32) -> (i32, i32) {
    %c0_i32 = arith.constant 0 : i32
    %c0_i32_0 = arith.constant 0 : i32
    return %arg0, %c0_i32 : i32, i32
  }
}

</mosaic_0001>

<bundles_post_ra>
// kernel: tpu_custom_call.1
= control target key start
LH: loop header
LB: loop body
LE: loop exit
PB: predicated region body
PF: predicated region fallthrough
CT: control target
= control target key end

     0   :  { %v303_v1 = vmov 0   ;;  %s366_s0 = inlined_call_operand.vmem [shape: f32[8,1], index: 0, kind: input, shape index: {}]   ;;  %s367_s1 = inlined_call_operand.vmem [shape: f32[1,32], index: 1, kind: input, shape index: {}]   ;;  %s368_s2 = inlined_call_operand.hbm [shape: f32[8,32], index: 2, kind: output, shape index: {}]  }
   0x1   :  { %v12_v0 = vld [vmem:[%s366_s0] sm:$0xff]  ;;  %274 = vset.pattern.permute.xlu0 %v303_v1 }
   0x2   :  { %16 = vperm.xlu0 %274, %v12_v0  }
   0x3   :  { %7 = vsyncpa [#allocation3], 0  ;;  %v253_v2 = vld [vmem:[%s367_s1] ss:$0 sm:$0xff]  ;;  %v304_v15 = vmov 683565275  }
   0x4   :  { %v305_v17 = vmov 2475754826   ;;  %v306_v20 = vmov 2131351028   ;;  %v307_v23 = vmov 2102212464  }
   0x5   :  { %v308_v26 = vmov 920167782   ;;  %v309_v29 = vmov 1326507024   ;;  %s310_s0 = smov [#allocation2]  }
   0x6   :  { %s245_s1 = sshll.u32 %s310_s0, 4  ;;  %s246_s1 = int_to_ptr.vmem [resolvable:$true] %s245_s1 }
   0x7   :  { %s279_s13 = scalar_lea.vmem %s246_s1, 128  ;;  %p284_p1 = scmp.lt.s32.totalorder %s246_s1, %s246_s1 }
   0x8   :  { %p280_p0 = scmp.ne.s32.totalorder %s246_s1, %s279_s13  ;;  %p285_p2 = scmp.lt.s32.totalorder %s279_s13, %s279_s13 }
   0xa   :  { %p286_p3 = por %p285_p2, %p284_p1 }
   0xc   :  { %p287_p4 = pnand %p286_p3, %p280_p0 }
  0x81   :  { %v17_v3 = vpop.permute.xlu0 %16 }
  0x82   :  { %v332_v4 = vmul.f32 %v253_v2, %v17_v3 }
  0x84   :  { %v32_v5 = vand.u32 2139095040, %v332_v4  ;;  %v29_v9 = vand.u32 2147483647, %v332_v4  ;;  %vm31_vm7 = vcmp.lt.s32.totalorder %v332_v4, 0 }
  0x86   :  { %v33_v6 = vshrl.u32 %v32_v5, 23  ;;  %v36_v12 = vand.u32 8388607, %v29_v9  ;;  %vm30_vm8 = vcmp.le.f32.partialorder %v29_v9, 0.7853982 }
  0x88   :  { %v254_v7 = vadd.s32 4294967169, %v33_v6  ;;  %v37_v31 = vor.u32 8388608, %v36_v12 }
  0x8a   :  { %v39_v8 = vadd.s32 1, %v254_v7  ;;  %v77_v45 = vshll.u32 %v37_v31, 8 }
  0x8c   :  { %vm40_vm0 = vcmp.gt.s32.totalorder %v39_v8, 0 }
  0x8d   :  { %v41_v10 = vsel %vm40_vm0, %v39_v8, 0  ;;  %vm121_vm0 = vweird.f32 %v332_v4 }
  0x8e   :  { %v43_v11 = vand.u32 31, %v41_v10  ;;  %v42_v14 = vshrl.u32 %v41_v10, 5 }
  0x90   :  { %v44_v13 = vsub.s32 32, %v43_v11  ;;  %v46_v16 = vshll.u32 %v304_v15, %v43_v11  ;;  %v49_v18 = vshll.u32 %v305_v17, %v43_v11  ;;  %v52_v22 = vshll.u32 %v306_v20, %v43_v11 }
  0x91   :  { %v55_v25 = vshll.u32 %v307_v23, %v43_v11  ;;  %v58_v28 = vshll.u32 %v308_v26, %v43_v11  ;;  %vm61_vm1 = vcmp.lt.s32.totalorder %v42_v14, 1  ;;  %vm64_vm2 = vcmp.lt.s32.totalorder %v42_v14, 4 }
  0x92   :  { %v47_v19 = vshrl.u32 %v305_v17, %v44_v13  ;;  %v50_v21 = vshrl.u32 %v306_v20, %v44_v13  ;;  %v53_v24 = vshrl.u32 %v307_v23, %v44_v13  ;;  %v56_v27 = vshrl.u32 %v308_v26, %v44_v13 }
  0x93   :  { %v59_v30 = vshrl.u32 %v309_v29, %v44_v13  ;;  %v45_v40 = vshrl.u32 %v304_v15, %v44_v13  ;;  %vm63_vm3 = vcmp.lt.s32.totalorder %v42_v14, 3  ;;  %vm62_vm4 = vcmp.lt.s32.totalorder %v42_v14, 2 }
  0x94   :  { %v48_v32 = vor.u32 %v47_v19, %v46_v16  ;;  %v51_v33 = vor.u32 %v50_v21, %v49_v18  ;;  %v54_v34 = vor.u32 %v53_v24, %v52_v22  ;;  %v57_v35 = vor.u32 %v56_v27, %v55_v25 }
  0x95   :  { %v60_v36 = vor.u32 %v59_v30, %v58_v28  ;;  %v26_v24 = vlaneseq }
  0x96   :  { %v66_v37 = vsel %vm64_vm2, %v54_v34, 2102212464  ;;  %v69_v38 = vsel %vm61_vm1, %v48_v32, %v51_v33  ;;  %v73_v39 = vsel %vm61_vm1, %v51_v33, %v54_v34  ;;  %v70_v41 = vsel %vm64_vm2, %v57_v35, 920167782 }
  0x97   :  { %v74_v42 = vsel %vm64_vm2, %v60_v36, 1326507024  ;;  %v71_v43 = vsel %vm63_vm3, %v54_v34, %v70_v41  ;;  %v65_v46 = vsel %vm61_vm1, %v45_v40, %v48_v32  ;;  %v67_v47 = vsel %vm63_vm3, %v51_v33, %v66_v37 }
  0x98   :  { %v75_v44 = vsel %vm63_vm3, %v57_v35, %v74_v42  ;;  %v72_v48 = vsel %vm62_vm4, %v69_v38, %v71_v43  ;;  %v68_v54 = vsel %vm62_vm4, %v65_v46, %v67_v47  ;;  %v27_v26 = vand.u32 127, %v26_v24 }
  0x99   :  { %v76_v49 = vsel %vm62_vm4, %v73_v39, %v75_v44  ;;  %v341_v52 = vmul.u32.u64.low %v77_v45, %v72_v48  ;;  %v342_v53 = vmul.u32.u64.high %v77_v45, %v72_v48, %v341_v52  ;;  %v84_v56 = vmul.u32 %v77_v45, %v68_v54 }
  0x9a   :  { %v338_v50 = vmul.u32.u64.low %v77_v45, %v76_v49  ;;  %v339_v51 = vmul.u32.u64.high %v77_v45, %v76_v49, %v338_v50  ;;  %vm28_vm9 = vcmp.lt.s32.totalorder %v27_v26, 16  ;;  %vm237_vm1 = vcmask 261120  }
  0x9b   :  { %v87_v55 = vadd.s32 1, %v342_v53 }
  0x9c   :  { %vm86_vm5 = vc.u32 %v339_v51, %v341_v52  ;;  %v85_v5 = vadd.s32 %v341_v52, %v339_v51 }
  0x9d   :  { %v88_v57 = vsel %vm86_vm5, %v87_v55, %v342_v53 }
  0x9e   :  { %v89_v58 = vadd.s32 %v88_v57, %v84_v56 }
  0xa0   :  { %v90_v59 = vadd.s32 536870912, %v89_v58 }
  0xa2   :  { %v91_v60 = vshrl.u32 %v90_v59, 30 }
  0xa4   :  { %v92_v61 = vshll.u32 %v91_v60, 30  ;;  %v115_v18 = vsub.s32 4, %v91_v60 }
  0xa6   :  { %v93_v62 = vsub.s32 %v89_v58, %v92_v61  ;;  %v116_v21 = vsel %vm31_vm7, %v115_v18, %v91_v60 }
  0xa7   :  { %v118_v23 = vsel %vm30_vm8, 0, %v116_v21 }
  0xa8   :  { %v95_v63 = vsub.s32 0, %v93_v62  ;;  %v122_v25 = vadd.s32 3, %v118_v23  ;;  %v226_v28 = vand.u32 3, %v118_v23 }
  0xaa   :  { %v255_v0 = vmin.u32 %v95_v63, %v93_v62  ;;  %v123_v27 = vand.u32 3, %v122_v25  ;;  %vm231_vm11 = vcmp.eq.s32.totalorder %v226_v28, 2  ;;  %vm228_vm13 = vcmp.eq.s32.totalorder %v226_v28, 0 }
  0xab   :  { %vm227_vm15 = vcmp.lt.s32.totalorder %v226_v28, 2 }
  0xac   :  { %v97_v1 = vclz %v255_v0  ;;  %vm128_vm10 = vcmp.eq.s32.totalorder %v123_v27, 2  ;;  %vm125_vm12 = vcmp.eq.s32.totalorder %v123_v27, 0  ;;  %vm124_vm14 = vcmp.lt.s32.totalorder %v123_v27, 2 }
  0xae   :  { %v256_v2 = vadd.s32 4294967294, %v97_v1 }
  0xb0   :  { %vm257_vm6 = vcmp.lt.s32.totalorder %v256_v2, 0 }
  0xb1   :  { %v100_v3 = vsel %vm257_vm6, 0, %v256_v2 }
  0xb2   :  { %v101_v6 = vsub.s32 32, %v100_v3  ;;  %v105_v7 = vsub.s32 4294967266, %v100_v3  ;;  %v102_v8 = vshll.u32 %v93_v62, %v100_v3 }
  0xb4   :  { %v103_v10 = vshrl.u32 %v85_v5, %v101_v6  ;;  %v106_v11 = vadd.s32 127, %v105_v7 }
  0xb6   :  { %v104_v12 = vor.u32 %v103_v10, %v102_v8  ;;  %v107_v13 = vshll.u32 %v106_v11, 23 }
  0xb8   :  { %v108_v14 = vor.u32 4788187, %v107_v13  ;;  %v111_v16 = vcvt.s32.f32 %v104_v12 }
  0xba   :  { %v109_v15 = vand.u32 2147483647, %v108_v14 }
  0xbc   :  { %v112_v17 = vmul.f32 %v111_v16, %v109_v15 }
  0xbe   :  { %v113_v19 = vxor.u32 2147483648, %v112_v17 }
  0xc0   :  { %v114_v20 = vsel %vm31_vm7, %v113_v19, %v112_v17 }
  0xc1   :  { %v117_v22 = vsel %vm30_vm8, %v332_v4, %v114_v20 }
  0xc2   :  { %275 = vcosq.f32 %v117_v22 }
  0xc3   :  { %277 = vsinq.f32 %v117_v22 }
  0xcc   :  { %v276_v29 = vpop.eup %275 }
  0xcd   :  { %v278_v30 = vpop.eup %277  ;;  %v129_v31 = vxor.u32 2147483648, %v276_v29 }
  0xce   :  { %v126_v32 = vxor.u32 2147483648, %v278_v30 }
  0xcf   :  { %v130_v9 = vsel %vm128_vm10, %v129_v31, %v278_v30  ;;  %v233_v33 = vsel %vm231_vm11, %v129_v31, %v278_v30 }
  0xd0   :  { %v127_v34 = vsel %vm125_vm12, %v276_v29, %v126_v32  ;;  %v230_v35 = vsel %vm228_vm13, %v276_v29, %v126_v32 }
  0xd1   :  { %v131_v36 = vsel %vm124_vm14, %v127_v34, %v130_v9  ;;  %v234_v37 = vsel %vm227_vm15, %v230_v35, %v233_v33 }
  0xd2   :  { %v132_v38 = vsel %vm121_vm0, nan, %v131_v36  ;;  %v235_v39 = vsel %vm121_vm0, nan, %v234_v37 }
  0xd3   :  { %v236_v40 = vsel %vm28_vm9, %v132_v38, %v235_v39 }
  0xd4   :  { %238 = vst.msk [vmem:[#allocation2] sm:$0xff] %vm237_vm1, %v236_v40 }
  0xd5   :  { %290 = shalt.err (!%p287_p4)
}
  0xd6   :  { %s291_s16 = scalar_lea.hbm %s368_s2, 128 }
  0xd7   :  { %p292_p5 = scmp.ne.s32.totalorder %s368_s2, %s291_s16  ;;  %p295_p6 = scmp.lt.u32.totalorder %s291_s16, %s368_s2 }
  0xd9   :  { %p297_p7 = pnand %p295_p6, %p292_p5 }
  0xdb   :  { %300 = shalt.err (!%p297_p7)
}
  0xdc   :  { %248 = dma.vmem_to_hbm [thread:$0]  %s246_s1, 128, %s368_s2, [#allocation3]  }
  0xdd   :  { %301 = dma.done.wait [#allocation3], 128  }
  0xde   :  { %302 = vsyncadd [#allocation3], 4294967168 }
  0xdf   :  { %252 = vsyncpa [#allocation3], 1 }

</bundles_post_ra>
